<compile_context>
chip_gen: v6e
topology: v6e:2x2x1
jax: 0.10.0
libtpu: 0.0.40
codegen_flags: <defaults>
</compile_context>

<pallas_src>
import functools

import jax
import jax.numpy as jnp
from jax import lax
from jax.experimental import pallas as pl
from jax.experimental.pallas import tpu as pltpu

EPS = 1e-6  # matches torch pairwise_distance / TripletMarginLoss eps


def _sparse_loss_kernel(feat_ref, lab_col_ref, lab_row_ref, rp_ref, rn_ref, aux_ref,
                        out_ref,
                        oh_p_sc, oh_n_sc, valid_sc, acc_ap_sc, acc_an_sc,
                        *, margin, dw, sw, qw, tw):
    t = pl.program_id(0)
    nt = pl.num_programs(0)

    # ---- one-time: build random positive/negative one-hot selectors ----
    @pl.when(t == 0)
    def _init():
        B = lab_col_ref.shape[0]
        lc = lab_col_ref[...]                                   # (B, 1) int32
        lr = lab_row_ref[...]                                   # (1, B) int32
        same = lc == lr                                         # (B, B)
        row_i = lax.broadcasted_iota(jnp.int32, (B, B), 0)
        col_j = lax.broadcasted_iota(jnp.int32, (B, B), 1)
        not_self = row_i != col_j
        pos_mask = jnp.logical_and(same, not_self)
        neg_mask = jnp.logical_not(same)

        def select(mask, rnd):
            # uniform random valid candidate: max of masked uniforms -> one-hot
            score = jnp.where(mask, rnd, -1.0)                  # rnd in [0,1)
            smax = jnp.max(score, axis=1, keepdims=True)        # (B, 1)
            valid = smax >= 0.0                                 # any valid candidate
            oh = jnp.where(jnp.logical_and(score == smax, mask), 1.0, 0.0)
            oh = oh / jnp.maximum(jnp.sum(oh, axis=1, keepdims=True), 1.0)
            return oh, valid

        ohp, vp = select(pos_mask, rp_ref[...])
        ohn, vn = select(neg_mask, rn_ref[...])
        oh_p_sc[...] = ohp
        oh_n_sc[...] = ohn
        valid_sc[...] = jnp.where(jnp.logical_and(vp, vn), 1.0, 0.0)
        acc_ap_sc[...] = jnp.zeros_like(acc_ap_sc)
        acc_an_sc[...] = jnp.zeros_like(acc_an_sc)

    # ---- every feature tile: accumulate squared distances ----
    f = feat_ref[...].astype(jnp.float32)                       # (B, TD)
    p = jnp.dot(oh_p_sc[...], f, preferred_element_type=jnp.float32)
    n = jnp.dot(oh_n_sc[...], f, preferred_element_type=jnp.float32)
    dap = f - p + EPS
    dan = f - n + EPS
    acc_ap_sc[...] += jnp.sum(dap * dap, axis=1, keepdims=True)  # (B, 1)
    acc_an_sc[...] += jnp.sum(dan * dan, axis=1, keepdims=True)

    # ---- last tile: finalize losses and pack into one output row ----
    @pl.when(t == nt - 1)
    def _finalize():
        d_ap = jnp.sqrt(acc_ap_sc[...])                          # (B, 1)
        d_an = jnp.sqrt(acc_an_sc[...])
        per = jnp.maximum(d_ap - d_an + margin, 0.0)             # (B, 1)
        v = valid_sc[...]                                        # (B, 1) {0,1}
        cnt = jnp.sum(v, axis=0, keepdims=True)                  # (1, 1)
        trip = jnp.sum(per * v, axis=0, keepdims=True) / jnp.maximum(cnt, 1.0)

        distill = aux_ref[0]
        sparsity = aux_ref[1]
        quant = aux_ref[2]
        total = dw * distill + sw * sparsity + qw * quant + tw * trip  # (1, 1)

        lane = lax.broadcasted_iota(jnp.int32, out_ref.shape, 1)       # (1, 128)
        packed = (jnp.where(lane == 0, total, 0.0)
                  + jnp.where(lane == 1, distill, 0.0)
                  + jnp.where(lane == 2, sparsity, 0.0)
                  + jnp.where(lane == 3, quant, 0.0)
                  + jnp.where(lane == 4, trip, 0.0))
        out_ref[...] = packed


def _pick_feature_tile(d):
    """Lane-aligned feature tile; prefer >=2 tiles of a 128-multiple width."""
    if d % 128 != 0:
        return d
    for cand in (512, 256, 128):
        if d % cand == 0 and d // cand >= 2:
            return cand
    return d


@functools.partial(
    jax.jit,
    static_argnames=("distill_weight", "sparsity_weight", "quant_weight",
                     "triplet_weight", "margin"))
def _sparse_loss_triplet_pallas(feats, labels, distill, sparsity, quant, key, *,
                                distill_weight, sparsity_weight, quant_weight,
                                triplet_weight, margin):
    B, D = feats.shape
    kp, kn = jax.random.split(key)
    rand_p = jax.random.uniform(kp, (B, B), jnp.float32)
    rand_n = jax.random.uniform(kn, (B, B), jnp.float32)

    lab = labels.astype(jnp.int32)
    lab_col = lab.reshape(B, 1)
    lab_row = lab.reshape(1, B)
    aux = jnp.stack([distill, sparsity, quant]).astype(jnp.float32)   # (3,) -> SMEM

    td = _pick_feature_tile(D)
    nt = D // td

    kernel = functools.partial(
        _sparse_loss_kernel,
        margin=float(margin), dw=float(distill_weight), sw=float(sparsity_weight),
        qw=float(quant_weight), tw=float(triplet_weight))

    feat_spec = pl.BlockSpec((B, td), lambda t: (0, t))           # tiled over D
    col_spec = pl.BlockSpec((B, 1), lambda t: (0, 0))             # resident
    row_spec = pl.BlockSpec((1, B), lambda t: (0, 0))             # resident
    rnd_spec = pl.BlockSpec((B, B), lambda t: (0, 0))             # resident
    aux_spec = pl.BlockSpec(memory_space=pltpu.MemorySpace.SMEM)  # scalars in SMEM
    out_spec = pl.BlockSpec((1, 128), lambda t: (0, 0))           # packed scalars

    cost = pl.CostEstimate(
        flops=int(4 * B * B * D + 12 * B * D),
        transcendentals=int(2 * B),
        bytes_accessed=int(4 * B * D + 8 * B * B + 8 * B + 4 * 3 + 4 * 128))

    out = pl.pallas_call(
        kernel,
        out_shape=jax.ShapeDtypeStruct((1, 128), jnp.float32),
        grid_spec=pltpu.PrefetchScalarGridSpec(
            num_scalar_prefetch=0,
            grid=(nt,),
            in_specs=[feat_spec, col_spec, row_spec, rnd_spec, rnd_spec, aux_spec],
            out_specs=out_spec,
            scratch_shapes=[
                pltpu.VMEM((B, B), jnp.float32),   # one-hot positive selector
                pltpu.VMEM((B, B), jnp.float32),   # one-hot negative selector
                pltpu.VMEM((B, 1), jnp.float32),   # valid-anchor mask
                pltpu.VMEM((B, 1), jnp.float32),   # sum (a-p+eps)^2
                pltpu.VMEM((B, 1), jnp.float32),   # sum (a-n+eps)^2
            ]),
        compiler_params=pltpu.CompilerParams(dimension_semantics=("arbitrary",)),
        cost_estimate=cost,
    )(feats, lab_col, lab_row, rand_p, rand_n, aux)

    return {
        "total": out[0, 0],
        "distill": out[0, 1],
        "sparsity": out[0, 2],
        "quant": out[0, 3],
        "triplet": out[0, 4],
    }


def sparse_loss(output_features, labels=None, distill_loss=0.0, sparsity_loss=0.0,
                quant_loss=0.0, *, key=None, distill_weight=0.5, sparsity_weight=0.1,
                quant_weight=0.2, triplet_weight=0.2, margin=0.3):
    """JAX/Pallas equivalent of SPARSELoss.forward (returns the same dict of losses)."""
    feats = jnp.asarray(output_features, jnp.float32)
    B = feats.shape[0]
    distill = jnp.asarray(distill_loss, jnp.float32)
    sparsity = jnp.asarray(sparsity_loss, jnp.float32)
    quant = jnp.asarray(quant_loss, jnp.float32)

    if labels is None or B < 3:
        trip = jnp.float32(0.0)
        total = (distill_weight * distill + sparsity_weight * sparsity
                 + quant_weight * quant + triplet_weight * trip)
        return {"total": total, "distill": distill, "sparsity": sparsity,
                "quant": quant, "triplet": trip}

    if key is None:
        key = jax.random.PRNGKey(0)
    return _sparse_loss_triplet_pallas(
        feats, jnp.asarray(labels), distill, sparsity, quant, key,
        distill_weight=float(distill_weight), sparsity_weight=float(sparsity_weight),
        quant_weight=float(quant_weight), triplet_weight=float(triplet_weight),
        margin=float(margin))


def _sparse_loss_ref(feats, labels, distill, sparsity, quant, key, *,
                     dw=0.5, sw=0.1, qw=0.2, tw=0.2, margin=0.3):
    """Pure-JAX reference using the identical random selection."""
    B, D = feats.shape
    kp, kn = jax.random.split(key)
    rp = jax.random.uniform(kp, (B, B), jnp.float32)
    rn = jax.random.uniform(kn, (B, B), jnp.float32)
    same = labels[:, None] == labels[None, :]
    not_self = ~jnp.eye(B, dtype=bool)
    pos_mask = same & not_self
    neg_mask = ~same

    def pick(mask, r):
        score = jnp.where(mask, r, -1.0)
        return jnp.argmax(score, axis=1), jnp.any(mask, axis=1)

    pi, vp = pick(pos_mask, rp)
    ni, vn = pick(neg_mask, rn)
    p = feats[pi]
    n = feats[ni]
    d_ap = jnp.sqrt(jnp.sum((feats - p + EPS) ** 2, axis=1))
    d_an = jnp.sqrt(jnp.sum((feats - n + EPS) ** 2, axis=1))
    per = jnp.maximum(d_ap - d_an + margin, 0.0)
    v = (vp & vn).astype(jnp.float32)
    trip = jnp.sum(per * v) / jnp.maximum(jnp.sum(v), 1.0)
    total = dw * distill + sw * sparsity + qw * quant + tw * trip
    return {"total": total, "distill": distill, "sparsity": sparsity,
            "quant": quant, "triplet": trip}


if __name__ == "__main__":
    B, D = 8, 256  # small demo; D=256 with 128-wide tiles -> 2 grid steps

    key = jax.random.PRNGKey(0)
    kf, kl = jax.random.split(key)
    feats = jax.random.normal(kf, (B, D), jnp.float32)
    labels = jax.random.randint(kl, (B,), 0, 3, jnp.int32)
    distill = jnp.float32(0.37)
    sparsity = jnp.float32(0.12)
    quant = jnp.float32(0.45)
    sel_key = jax.random.PRNGKey(42)

    out = sparse_loss(feats, labels, distill, sparsity, quant, key=sel_key)
    jax.block_until_ready(out)

    ref = _sparse_loss_ref(feats, labels, distill, sparsity, quant, sel_key)
    for k in ("total", "distill", "sparsity", "quant", "triplet"):
        assert jnp.allclose(out[k], ref[k], atol=1e-4, rtol=1e-4), (k, out[k], ref[k])
    assert float(out["triplet"]) >= 0.0
    # check the weighting identity explicitly
    recon_total = (0.5 * out["distill"] + 0.1 * out["sparsity"]
                   + 0.2 * out["quant"] + 0.2 * out["triplet"])
    assert jnp.allclose(out["total"], recon_total, atol=1e-5)

    print("KERNEL_OK")
</pallas_src>

<mosaic_0001>
module attributes {stable_mosaic.version = 11 : i64} {
  func.func @_sparse_loss_kernel(%arg0: i32, %arg1: memref<8x128xf32, #tpu.memory_space<vmem>>, %arg2: memref<8x1xi32, #tpu.memory_space<vmem>>, %arg3: memref<1x8xi32, #tpu.memory_space<vmem>>, %arg4: memref<8x8xf32, #tpu.memory_space<vmem>>, %arg5: memref<8x8xf32, #tpu.memory_space<vmem>>, %arg6: memref<3xf32, #tpu.memory_space<smem>>, %arg7: memref<1x128xf32, #tpu.memory_space<vmem>>, %arg8: memref<8x8xf32, #tpu.memory_space<vmem>>, %arg9: memref<8x8xf32, #tpu.memory_space<vmem>>, %arg10: memref<8x1xf32, #tpu.memory_space<vmem>>, %arg11: memref<8x1xf32, #tpu.memory_space<vmem>>, %arg12: memref<8x1xf32, #tpu.memory_space<vmem>>) attributes {dimension_semantics = [#tpu.dimension_semantics<arbitrary>], iteration_bounds = array<i64: 2>, scalar_prefetch = 0 : i64, scratch_operands = 5 : i64, tpu.core_type = #tpu.core_type<tc>, window_params = [{transform_indices = @transform_0, window_bounds = array<i64: 8, 128>}, {pipeline_mode = #tpu.pipeline_mode<synchronous>, transform_indices = @transform_1, window_bounds = array<i64: 8, 1>}, {pipeline_mode = #tpu.pipeline_mode<synchronous>, transform_indices = @transform_2, window_bounds = array<i64: 1, 8>}, {pipeline_mode = #tpu.pipeline_mode<synchronous>, transform_indices = @transform_3, window_bounds = array<i64: 8, 8>}, {pipeline_mode = #tpu.pipeline_mode<synchronous>, transform_indices = @transform_4, window_bounds = array<i64: 8, 8>}, {transform_indices = @transform_5, window_bounds = array<i64: 3>}, {pipeline_mode = #tpu.pipeline_mode<synchronous>, transform_indices = @transform_6, window_bounds = array<i64: 1, 128>}]} {
    %c0_i32 = arith.constant 0 : i32
    %0 = arith.cmpi eq, %arg0, %c0_i32 : i32
    %1 = arith.extui %0 : i1 to i32
    %c0_i32_0 = arith.constant 0 : i32
    %2 = arith.cmpi ne, %1, %c0_i32_0 : i32
    scf.if %2 {
      %c0_20 = arith.constant 0 : index
      %c0_21 = arith.constant 0 : index
      %29 = vector.load %arg2[%c0_20, %c0_21] : memref<8x1xi32, #tpu.memory_space<vmem>>, vector<8x1xi32>
      %c0_22 = arith.constant 0 : index
      %c0_23 = arith.constant 0 : index
      %30 = vector.load %arg3[%c0_22, %c0_23] : memref<1x8xi32, #tpu.memory_space<vmem>>, vector<1x8xi32>
      %31 = vector.broadcast %29 : vector<8x1xi32> to vector<8x8xi32>
      %32 = vector.broadcast %30 : vector<1x8xi32> to vector<8x8xi32>
      %33 = arith.cmpi eq, %31, %32 : vector<8x8xi32>
      %34 = tpu.iota {dimensions = array<i32: 0>} : vector<8x8xi32>
      %35 = tpu.iota {dimensions = array<i32: 1>} : vector<8x8xi32>
      %36 = arith.cmpi ne, %34, %35 : vector<8x8xi32>
      %37 = arith.andi %33, %36 : vector<8x8xi1>
      %cst_24 = arith.constant dense<true> : vector<8x8xi1>
      %38 = arith.xori %33, %cst_24 : vector<8x8xi1>
      %c0_25 = arith.constant 0 : index
      %c0_26 = arith.constant 0 : index
      %39 = vector.load %arg4[%c0_25, %c0_26] : memref<8x8xf32, #tpu.memory_space<vmem>>, vector<8x8xf32>
      %cst_27 = arith.constant -1.000000e+00 : f32
      %40 = vector.broadcast %cst_27 : f32 to vector<8x8xf32>
      %41 = arith.select %37, %39, %40 : vector<8x8xi1>, vector<8x8xf32>
      %cst_28 = arith.constant dense<0xFF800000> : vector<8xf32>
      %42 = vector.multi_reduction <maximumf>, %41, %cst_28 [1] : vector<8x8xf32> to vector<8xf32>
      %43 = vector.shape_cast %42 : vector<8xf32> to vector<8x1xf32>
      %cst_29 = arith.constant 0.000000e+00 : f32
      %44 = vector.broadcast %cst_29 : f32 to vector<8x1xf32>
      %45 = arith.cmpf oge, %43, %44 : vector<8x1xf32>
      %46 = vector.broadcast %43 : vector<8x1xf32> to vector<8x8xf32>
      %47 = arith.cmpf oeq, %41, %46 : vector<8x8xf32>
      %48 = arith.andi %47, %37 : vector<8x8xi1>
      %cst_30 = arith.constant 1.000000e+00 : f32
      %cst_31 = arith.constant 0.000000e+00 : f32
      %49 = vector.broadcast %cst_30 : f32 to vector<8x8xf32>
      %50 = vector.broadcast %cst_31 : f32 to vector<8x8xf32>
      %51 = arith.select %48, %49, %50 : vector<8x8xi1>, vector<8x8xf32>
      %cst_32 = arith.constant dense<0.000000e+00> : vector<8xf32>
      %52 = vector.multi_reduction <add>, %51, %cst_32 [1] : vector<8x8xf32> to vector<8xf32>
      %53 = vector.shape_cast %52 : vector<8xf32> to vector<8x1xf32>
      %cst_33 = arith.constant 1.000000e+00 : f32
      %54 = vector.broadcast %cst_33 : f32 to vector<8x1xf32>
      %55 = arith.maximumf %53, %54 : vector<8x1xf32>
      %56 = vector.broadcast %55 : vector<8x1xf32> to vector<8x8xf32>
      %57 = arith.divf %51, %56 : vector<8x8xf32>
      %c0_34 = arith.constant 0 : index
      %c0_35 = arith.constant 0 : index
      %58 = vector.load %arg5[%c0_34, %c0_35] : memref<8x8xf32, #tpu.memory_space<vmem>>, vector<8x8xf32>
      %cst_36 = arith.constant -1.000000e+00 : f32
      %59 = vector.broadcast %cst_36 : f32 to vector<8x8xf32>
      %60 = arith.select %38, %58, %59 : vector<8x8xi1>, vector<8x8xf32>
      %cst_37 = arith.constant dense<0xFF800000> : vector<8xf32>
      %61 = vector.multi_reduction <maximumf>, %60, %cst_37 [1] : vector<8x8xf32> to vector<8xf32>
      %62 = vector.shape_cast %61 : vector<8xf32> to vector<8x1xf32>
      %cst_38 = arith.constant 0.000000e+00 : f32
      %63 = vector.broadcast %cst_38 : f32 to vector<8x1xf32>
      %64 = arith.cmpf oge, %62, %63 : vector<8x1xf32>
      %65 = vector.broadcast %62 : vector<8x1xf32> to vector<8x8xf32>
      %66 = arith.cmpf oeq, %60, %65 : vector<8x8xf32>
      %67 = arith.andi %66, %38 : vector<8x8xi1>
      %cst_39 = arith.constant 1.000000e+00 : f32
      %cst_40 = arith.constant 0.000000e+00 : f32
      %68 = vector.broadcast %cst_39 : f32 to vector<8x8xf32>
      %69 = vector.broadcast %cst_40 : f32 to vector<8x8xf32>
      %70 = arith.select %67, %68, %69 : vector<8x8xi1>, vector<8x8xf32>
      %cst_41 = arith.constant dense<0.000000e+00> : vector<8xf32>
      %71 = vector.multi_reduction <add>, %70, %cst_41 [1] : vector<8x8xf32> to vector<8xf32>
      %72 = vector.shape_cast %71 : vector<8xf32> to vector<8x1xf32>
      %cst_42 = arith.constant 1.000000e+00 : f32
      %73 = vector.broadcast %cst_42 : f32 to vector<8x1xf32>
      %74 = arith.maximumf %72, %73 : vector<8x1xf32>
      %75 = vector.broadcast %74 : vector<8x1xf32> to vector<8x8xf32>
      %76 = arith.divf %70, %75 : vector<8x8xf32>
      %c0_43 = arith.constant 0 : index
      %c0_44 = arith.constant 0 : index
      %77 = vector.load %arg8[%c0_43, %c0_44] : memref<8x8xf32, #tpu.memory_space<vmem>>, vector<8x8xf32>
      tpu.vector_store %arg8[%c0_43, %c0_44], %57 {strides = array<i32>} : memref<8x8xf32, #tpu.memory_space<vmem>>, vector<8x8xf32>,
      %c0_45 = arith.constant 0 : index
      %c0_46 = arith.constant 0 : index
      %78 = vector.load %arg9[%c0_45, %c0_46] : memref<8x8xf32, #tpu.memory_space<vmem>>, vector<8x8xf32>
      tpu.vector_store %arg9[%c0_45, %c0_46], %76 {strides = array<i32>} : memref<8x8xf32, #tpu.memory_space<vmem>>, vector<8x8xf32>,
      %79 = arith.andi %45, %64 : vector<8x1xi1>
      %cst_47 = arith.constant 1.000000e+00 : f32
      %cst_48 = arith.constant 0.000000e+00 : f32
      %80 = vector.broadcast %cst_47 : f32 to vector<8x1xf32>
      %81 = vector.broadcast %cst_48 : f32 to vector<8x1xf32>
      %82 = arith.select %79, %80, %81 : vector<8x1xi1>, vector<8x1xf32>
      %c0_49 = arith.constant 0 : index
      %c0_50 = arith.constant 0 : index
      %83 = vector.load %arg10[%c0_49, %c0_50] : memref<8x1xf32, #tpu.memory_space<vmem>>, vector<8x1xf32>
      tpu.vector_store %arg10[%c0_49, %c0_50], %82 {strides = array<i32>} : memref<8x1xf32, #tpu.memory_space<vmem>>, vector<8x1xf32>,
      %cst_51 = arith.constant 0.000000e+00 : f32
      %84 = vector.broadcast %cst_51 : f32 to vector<8x1xf32>
      %c0_52 = arith.constant 0 : index
      %c0_53 = arith.constant 0 : index
      %85 = vector.load %arg11[%c0_52, %c0_53] : memref<8x1xf32, #tpu.memory_space<vmem>>, vector<8x1xf32>
      tpu.vector_store %arg11[%c0_52, %c0_53], %84 {strides = array<i32>} : memref<8x1xf32, #tpu.memory_space<vmem>>, vector<8x1xf32>,
      %cst_54 = arith.constant 0.000000e+00 : f32
      %86 = vector.broadcast %cst_54 : f32 to vector<8x1xf32>
      %c0_55 = arith.constant 0 : index
      %c0_56 = arith.constant 0 : index
      %87 = vector.load %arg12[%c0_55, %c0_56] : memref<8x1xf32, #tpu.memory_space<vmem>>, vector<8x1xf32>
      tpu.vector_store %arg12[%c0_55, %c0_56], %86 {strides = array<i32>} : memref<8x1xf32, #tpu.memory_space<vmem>>, vector<8x1xf32>,
    } else {
    }
    %c0 = arith.constant 0 : index
    %c0_1 = arith.constant 0 : index
    %3 = vector.load %arg1[%c0, %c0_1] : memref<8x128xf32, #tpu.memory_space<vmem>>, vector<8x128xf32>
    %c0_2 = arith.constant 0 : index
    %c0_3 = arith.constant 0 : index
    %4 = vector.load %arg8[%c0_2, %c0_3] : memref<8x8xf32, #tpu.memory_space<vmem>>, vector<8x8xf32>
    %cst = arith.constant dense<0.000000e+00> : vector<8x128xf32>
    %5 = tpu.matmul %4, %3, %cst {dimension_numbers = #tpu.dot_dimension_numbers<[1], [0], [0], [1], [0, 0, 1, 1], [], []>} : vector<8x8xf32>, vector<8x128xf32>, vector<8x128xf32> -> vector<8x128xf32>
    %c0_4 = arith.constant 0 : index
    %c0_5 = arith.constant 0 : index
    %6 = vector.load %arg9[%c0_4, %c0_5] : memref<8x8xf32, #tpu.memory_space<vmem>>, vector<8x8xf32>
    %cst_6 = arith.constant dense<0.000000e+00> : vector<8x128xf32>
    %7 = tpu.matmul %6, %3, %cst_6 {dimension_numbers = #tpu.dot_dimension_numbers<[1], [0], [0], [1], [0, 0, 1, 1], [], []>} : vector<8x8xf32>, vector<8x128xf32>, vector<8x128xf32> -> vector<8x128xf32>
    %8 = arith.subf %3, %5 : vector<8x128xf32>
    %cst_7 = arith.constant 9.99999997E-7 : f32
    %9 = vector.broadcast %cst_7 : f32 to vector<8x128xf32>
    %10 = arith.addf %8, %9 : vector<8x128xf32>
    %11 = arith.subf %3, %7 : vector<8x128xf32>
    %cst_8 = arith.constant 9.99999997E-7 : f32
    %12 = vector.broadcast %cst_8 : f32 to vector<8x128xf32>
    %13 = arith.addf %11, %12 : vector<8x128xf32>
    %c0_9 = arith.constant 0 : index
    %c0_10 = arith.constant 0 : index
    %14 = vector.load %arg11[%c0_9, %c0_10] : memref<8x1xf32, #tpu.memory_space<vmem>>, vector<8x1xf32>
    %15 = arith.mulf %10, %10 : vector<8x128xf32>
    %cst_11 = arith.constant dense<0.000000e+00> : vector<8xf32>
    %16 = vector.multi_reduction <add>, %15, %cst_11 [1] : vector<8x128xf32> to vector<8xf32>
    %17 = vector.shape_cast %16 : vector<8xf32> to vector<8x1xf32>
    %18 = arith.addf %14, %17 : vector<8x1xf32>
    %c0_12 = arith.constant 0 : index
    %c0_13 = arith.constant 0 : index
    %19 = vector.load %arg11[%c0_12, %c0_13] : memref<8x1xf32, #tpu.memory_space<vmem>>, vector<8x1xf32>
    tpu.vector_store %arg11[%c0_12, %c0_13], %18 {strides = array<i32>} : memref<8x1xf32, #tpu.memory_space<vmem>>, vector<8x1xf32>,
    %c0_14 = arith.constant 0 : index
    %c0_15 = arith.constant 0 : index
    %20 = vector.load %arg12[%c0_14, %c0_15] : memref<8x1xf32, #tpu.memory_space<vmem>>, vector<8x1xf32>
    %21 = arith.mulf %13, %13 : vector<8x128xf32>
    %cst_16 = arith.constant dense<0.000000e+00> : vector<8xf32>
    %22 = vector.multi_reduction <add>, %21, %cst_16 [1] : vector<8x128xf32> to vector<8xf32>
    %23 = vector.shape_cast %22 : vector<8xf32> to vector<8x1xf32>
    %24 = arith.addf %20, %23 : vector<8x1xf32>
    %c0_17 = arith.constant 0 : index
    %c0_18 = arith.constant 0 : index
    %25 = vector.load %arg12[%c0_17, %c0_18] : memref<8x1xf32, #tpu.memory_space<vmem>>, vector<8x1xf32>
    tpu.vector_store %arg12[%c0_17, %c0_18], %24 {strides = array<i32>} : memref<8x1xf32, #tpu.memory_space<vmem>>, vector<8x1xf32>,
    %c1_i32 = arith.constant 1 : i32
    %26 = arith.cmpi eq, %arg0, %c1_i32 : i32
    %27 = arith.extui %26 : i1 to i32
    %c0_i32_19 = arith.constant 0 : i32
    %28 = arith.cmpi ne, %27, %c0_i32_19 : i32
    scf.if %28 {
      %c0_20 = arith.constant 0 : index
      %c0_21 = arith.constant 0 : index
      %29 = vector.load %arg11[%c0_20, %c0_21] : memref<8x1xf32, #tpu.memory_space<vmem>>, vector<8x1xf32>
      %30 = math.sqrt %29 : vector<8x1xf32>
      %c0_22 = arith.constant 0 : index
      %c0_23 = arith.constant 0 : index
      %31 = vector.load %arg12[%c0_22, %c0_23] : memref<8x1xf32, #tpu.memory_space<vmem>>, vector<8x1xf32>
      %32 = math.sqrt %31 : vector<8x1xf32>
      %33 = arith.subf %30, %32 : vector<8x1xf32>
      %cst_24 = arith.constant 3.000000e-01 : f32
      %34 = vector.broadcast %cst_24 : f32 to vector<8x1xf32>
      %35 = arith.addf %33, %34 : vector<8x1xf32>
      %cst_25 = arith.constant 0.000000e+00 : f32
      %36 = vector.broadcast %cst_25 : f32 to vector<8x1xf32>
      %37 = arith.maximumf %35, %36 : vector<8x1xf32>
      %c0_26 = arith.constant 0 : index
      %c0_27 = arith.constant 0 : index
      %38 = vector.load %arg10[%c0_26, %c0_27] : memref<8x1xf32, #tpu.memory_space<vmem>>, vector<8x1xf32>
      %cst_28 = arith.constant dense<0.000000e+00> : vector<1xf32>
      %39 = vector.multi_reduction <add>, %38, %cst_28 [0] : vector<8x1xf32> to vector<1xf32>
      %40 = vector.shape_cast %39 : vector<1xf32> to vector<1x1xf32>
      %41 = arith.mulf %37, %38 : vector<8x1xf32>
      %cst_29 = arith.constant dense<0.000000e+00> : vector<1xf32>
      %42 = vector.multi_reduction <add>, %41, %cst_29 [0] : vector<8x1xf32> to vector<1xf32>
      %43 = vector.shape_cast %42 : vector<1xf32> to vector<1x1xf32>
      %cst_30 = arith.constant 1.000000e+00 : f32
      %44 = vector.broadcast %cst_30 : f32 to vector<1x1xf32>
      %45 = arith.maximumf %40, %44 : vector<1x1xf32>
      %46 = arith.divf %43, %45 : vector<1x1xf32>
      %c0_31 = arith.constant 0 : index
      %47 = memref.load %arg6[%c0_31] : memref<3xf32, #tpu.memory_space<smem>>
      %c1 = arith.constant 1 : index
      %48 = memref.load %arg6[%c1] : memref<3xf32, #tpu.memory_space<smem>>
      %c2 = arith.constant 2 : index
      %49 = memref.load %arg6[%c2] : memref<3xf32, #tpu.memory_space<smem>>
      %cst_32 = arith.constant 5.000000e-01 : f32
      %50 = arith.mulf %cst_32, %47 : f32
      %cst_33 = arith.constant 1.000000e-01 : f32
      %51 = arith.mulf %cst_33, %48 : f32
      %52 = arith.addf %50, %51 : f32
      %cst_34 = arith.constant 2.000000e-01 : f32
      %53 = arith.mulf %cst_34, %49 : f32
      %54 = arith.addf %52, %53 : f32
      %cst_35 = arith.constant 2.000000e-01 : f32
      %55 = vector.broadcast %cst_35 : f32 to vector<1x1xf32>
      %56 = arith.mulf %55, %46 : vector<1x1xf32>
      %57 = vector.broadcast %54 : f32 to vector<1x1xf32>
      %58 = arith.addf %57, %56 : vector<1x1xf32>
      %59 = tpu.iota {dimensions = array<i32: 1>} : vector<1x128xi32>
      %c0_i32_36 = arith.constant 0 : i32
      %60 = vector.broadcast %c0_i32_36 : i32 to vector<1x128xi32>
      %61 = arith.cmpi eq, %59, %60 : vector<1x128xi32>
      %cst_37 = arith.constant 0.000000e+00 : f32
      %62 = vector.shape_cast %58 : vector<1x1xf32> to vector<1x1xf32>
      %63 = vector.broadcast %62 : vector<1x1xf32> to vector<1x128xf32>
      %64 = vector.broadcast %cst_37 : f32 to vector<1x128xf32>
      %65 = arith.select %61, %63, %64 : vector<1x128xi1>, vector<1x128xf32>
      %c1_i32_38 = arith.constant 1 : i32
      %66 = vector.broadcast %c1_i32_38 : i32 to vector<1x128xi32>
      %67 = arith.cmpi eq, %59, %66 : vector<1x128xi32>
      %cst_39 = arith.constant 0.000000e+00 : f32
      %68 = vector.broadcast %47 : f32 to vector<1x128xf32>
      %69 = vector.broadcast %cst_39 : f32 to vector<1x128xf32>
      %70 = arith.select %67, %68, %69 : vector<1x128xi1>, vector<1x128xf32>
      %71 = arith.addf %65, %70 : vector<1x128xf32>
      %c2_i32 = arith.constant 2 : i32
      %72 = vector.broadcast %c2_i32 : i32 to vector<1x128xi32>
      %73 = arith.cmpi eq, %59, %72 : vector<1x128xi32>
      %cst_40 = arith.constant 0.000000e+00 : f32
      %74 = vector.broadcast %48 : f32 to vector<1x128xf32>
      %75 = vector.broadcast %cst_40 : f32 to vector<1x128xf32>
      %76 = arith.select %73, %74, %75 : vector<1x128xi1>, vector<1x128xf32>
      %77 = arith.addf %71, %76 : vector<1x128xf32>
      %c3_i32 = arith.constant 3 : i32
      %78 = vector.broadcast %c3_i32 : i32 to vector<1x128xi32>
      %79 = arith.cmpi eq, %59, %78 : vector<1x128xi32>
      %cst_41 = arith.constant 0.000000e+00 : f32
      %80 = vector.broadcast %49 : f32 to vector<1x128xf32>
      %81 = vector.broadcast %cst_41 : f32 to vector<1x128xf32>
      %82 = arith.select %79, %80, %81 : vector<1x128xi1>, vector<1x128xf32>
      %83 = arith.addf %77, %82 : vector<1x128xf32>
      %c4_i32 = arith.constant 4 : i32
      %84 = vector.broadcast %c4_i32 : i32 to vector<1x128xi32>
      %85 = arith.cmpi eq, %59, %84 : vector<1x128xi32>
      %cst_42 = arith.constant 0.000000e+00 : f32
      %86 = vector.shape_cast %46 : vector<1x1xf32> to vector<1x1xf32>
      %87 = vector.broadcast %86 : vector<1x1xf32> to vector<1x128xf32>
      %88 = vector.broadcast %cst_42 : f32 to vector<1x128xf32>
      %89 = arith.select %85, %87, %88 : vector<1x128xi1>, vector<1x128xf32>
      %90 = arith.addf %83, %89 : vector<1x128xf32>
      %c0_43 = arith.constant 0 : index
      %c0_44 = arith.constant 0 : index
      %91 = vector.load %arg7[%c0_43, %c0_44] : memref<1x128xf32, #tpu.memory_space<vmem>>, vector<1x128xf32>
      tpu.vector_store %arg7[%c0_43, %c0_44], %90 {strides = array<i32>} : memref<1x128xf32, #tpu.memory_space<vmem>>, vector<1x128xf32>,
    } else {
    }
    return
  }
  func.func @transform_0(%arg0: i32) -> (i32, i32) {
    %c0_i32 = arith.constant 0 : i32
    %c0_i32_0 = arith.constant 0 : i32
    return %c0_i32, %arg0 : i32, i32
  }
  func.func @transform_1(%arg0: i32) -> (i32, i32) {
    %c0_i32 = arith.constant 0 : i32
    %c0_i32_0 = arith.constant 0 : i32
    %c0_i32_1 = arith.constant 0 : i32
    return %c0_i32, %c0_i32_0 : i32, i32
  }
  func.func @transform_2(%arg0: i32) -> (i32, i32) {
    %c0_i32 = arith.constant 0 : i32
    %c0_i32_0 = arith.constant 0 : i32
    %c0_i32_1 = arith.constant 0 : i32
    return %c0_i32, %c0_i32_0 : i32, i32
  }
  func.func @transform_3(%arg0: i32) -> (i32, i32) {
    %c0_i32 = arith.constant 0 : i32
    %c0_i32_0 = arith.constant 0 : i32
    %c0_i32_1 = arith.constant 0 : i32
    return %c0_i32, %c0_i32_0 : i32, i32
  }
  func.func @transform_4(%arg0: i32) -> (i32, i32) {
    %c0_i32 = arith.constant 0 : i32
    %c0_i32_0 = arith.constant 0 : i32
    %c0_i32_1 = arith.constant 0 : i32
    return %c0_i32, %c0_i32_0 : i32, i32
  }
  func.func @transform_5(%arg0: i32) -> i32 {
    %c0_i32 = arith.constant 0 : i32
    %c0_i32_0 = arith.constant 0 : i32
    return %c0_i32 : i32
  }
  func.func @transform_6(%arg0: i32) -> (i32, i32) {
    %c0_i32 = arith.constant 0 : i32
    %c0_i32_0 = arith.constant 0 : i32
    %c0_i32_1 = arith.constant 0 : i32
    return %c0_i32, %c0_i32_0 : i32, i32
  }
}

</mosaic_0001>

<bundles_post_ra>
// kernel: _sparse_loss_triplet_pallas.1
= control target key start
LH: loop header
LB: loop body
LE: loop exit
PB: predicated region body
PF: predicated region fallthrough
CT: control target
= control target key end

     0   :  { %11 = vsyncpa [#allocation8], 0  ;;  %s734_s21 = smov 0   ;;  %s833_s0 = inlined_call_operand.vmem [shape: f32[8,256], index: 0, kind: input, shape index: {}]   ;;  %s834_s1 = inlined_call_operand.vmem [shape: s32[8,1], index: 1, kind: input, shape index: {}]   ;;  %s835_s2 = inlined_call_operand.vmem [shape: s32[1,8], index: 2, kind: input, shape index: {}]   ;;  %s836_s3 = inlined_call_operand.vmem [shape: f32[8,8], index: 3, kind: input, shape index: {}]   ;;  %s837_s4 = inlined_call_operand.vmem [shape: f32[8,8], index: 4, kind: input, shape index: {}]   ;;  %s838_s5 = inlined_call_operand.vmem [shape: f32[3], index: 5, kind: input, shape index: {}]   ;;  %s839_s6 = inlined_call_operand.vmem [shape: f32[1,128], index: 6, kind: output, shape index: {}]  }
   0x1 LB: > { %s740_s22 = sadd.s32 4294967295, %s690_s21   ;;  %p599_p0 = scmp.ge.s32.totalorder %s690_s21, 1  ;;  %s690_s21 = sphi %s734_s21, %s17_s21  }
   0x2   : > { %p174_p1 = scmp.lt.s32.totalorder %s690_s21, 3  ;;  %s199_s25 = sshll.u32 %s838_s5, 4  ;;  %s200_s25 = int_to_ptr.vmem [resolvable:$true] %s199_s25 }
   0x3   : > { %p636_p4 = scmp.eq.s32.totalorder %s740_s22, 0  ;;  %s665_s27 = scalar_lea.vmem %s200_s25, 16 }
   0x4   : > { %p748_p3 = pnand %p599_p0, %p174_p1  ;;  %p666_p7 = scmp.ne.s32.totalorder %s200_s25, %s665_s27 }
   0x5   : > { %p673_p11 = scmp.lt.s32.totalorder %s200_s25, %s200_s25  ;;  %p674_p12 = scmp.lt.s32.totalorder %s665_s27, %s665_s27 }
   0x6   : > { %p632_p5 = pneg %p748_p3 }
   0x7   : > { %p675_p13 = por %p674_p12, %p673_p11 }
   0x8   : > { %p633_p6 = pnand %p636_p4, %p632_p5 }
   0xa   : > { %p667_p8 = pneg %p633_p6 }
   0xc   : > { %p668_p9 = pnand %p667_p8, %p666_p7 }
   0xe   : > { %p669_p10 = pneg %p668_p9 }
  0x10   : > { %p676_p2 = pnand %p675_p13, %p669_p10 }
  0x12   : > { %679 = shalt.err (!%p676_p2)
}
  0x13   : > { %s692_s28 = smov [#allocation7]   ;;  %219 = sbr.rel (%p748_p3) target bundleno = 1001 (0x3e9), region = 44 }
  0x14   : > { %635 = dma.vmem_to_smem (!%p633_p6), %s200_s25, 16, %s692_s28, [#allocation8]  }
  0x18   : > { %685 = dma.done.wait (%p636_p4), [#allocation8], 16  }
  0x19   : > { %687 = vsyncadd (%p636_p4), [#allocation8], 4294967280 }
  0x1a   : > { %225 = sfence }
  0x1b   : > { %p244_p0 = scmp.lt.s32.totalorder %s740_s22, 1  ;;  %p841_p1 = scmp.ne.s32.totalorder %s740_s22, 0 }
  0x1d   : > { %s245_s29 = scalar_select %p244_p0, %s740_s22, 1 }
  0x1e   : > { %251 = sbr.rel (%p841_p1) target bundleno = 468 (0x1d4), region = 52 }
  0x1f   : > { %s604_s30 = sshll.u32 %s245_s29, 3 }
  0x20   : > { %s768_s9 = scalar_lea.vmem %s833_s0, %s604_s30 }
  0x23   : > { %v252_v0 = vld [vmem:[%s834_s1] sm:$0xff]  ;;  %v693_v1 = vmov 0   ;;  %v262_v2 = vlaneseq  ;;  %vm271_vm2 = vcmask 64512   ;;  %vm694_vm4 = vmmov 1  }
  0x24   : > { %653 = vset.pattern.permute.xlu0 %v693_v1  ;;  %v606_v5 = vld [vmem:[%s835_s2] ss:$0 sm:$0xff]  ;;  %vm304_vm6 = vcmask 7168   ;;  %v695_v15 = vmov 0.0  }
  0x25   : > { %255 = vperm.xlu0 %653, %v252_v0   ;;  %v263_v3 = vshrl.u32 %v262_v2, 7  ;;  %v265_v4 = vand.u32 127, %v262_v2  ;;  %v269_v7 = vld [vmem:[%s836_s3] sm:$0xff]  ;;  %306 = vst.msk [vmem:[#allocation5] sm:$0xff] %vm304_vm6, %v695_v15  ;;  %307 = vst.msk [vmem:[#allocation6] sm:$0xff] %vm304_vm6, %v695_v15 }
  0x26   : > { %v285_v8 = vld [vmem:[%s837_s4] sm:$0xff] }
  0x27   : > { %vm266_vm0 = vcmp.ne.s32.totalorder %v263_v3, %v265_v4 }
  0xa0   : > { %v256_v6 = vpop.permute.xlu0 %255 }
  0xa1   : > { %vm261_vm1 = vcmp.eq.s32.totalorder %v256_v6, %v606_v5 }
  0xa2   : > { %vm784_vm3 = vmand %vm261_vm1, %vm266_vm0 }
  0xa3   : > { %vm788_vm5 = vmxor %vm261_vm1, %vm694_vm4  ;;  %v270_v11 = vsel %vm784_vm3, %v269_v7, -1.0 }
  0xa4   : > { %v286_v12 = vsel %vm788_vm5, %v285_v8, -1.0  ;;  %v272_v13 = vsel %vm271_vm2, %v270_v11, -inf }
  0xa5   : > { %v287_v14 = vsel %vm271_vm2, %v286_v12, -inf  ;;  %273 = vmax.xlane.f32.xlu0 %v272_v13 }
  0xa6   : > { %288 = vmax.xlane.f32.xlu1 %v287_v14 }
 0x12e   : > { %v274_v16 = vpop.xlane.xlu0 %273 }
 0x12f   : > { %v289_v17 = vpop.xlane.xlu1 %288  ;;  %vm275_vm7 = vcmp.ge.f32.partialorder %v274_v16, 0.0  ;;  %vm276_vm8 = vcmp.eq.f32.partialorder %v270_v11, %v274_v16 }
 0x130   : > { %vm290_vm9 = vcmp.ge.f32.partialorder %v289_v17, 0.0  ;;  %vm291_vm10 = vcmp.eq.f32.partialorder %v286_v12, %v289_v17  ;;  %vm277_vm11 = vmand %vm276_vm8, %vm784_vm3 }
 0x131   : > { %vm302_vm12 = vmand %vm275_vm7, %vm290_vm9  ;;  %v278_v18 = vsel %vm277_vm11, 1.0, %v695_v15 }
 0x132   : > { %v303_v19 = vsel %vm302_vm12, 1.0, %v695_v15  ;;  %v279_v20 = vsel %vm271_vm2, %v278_v18, 0.0  ;;  %vm292_vm13 = vmand %vm291_vm10, %vm788_vm5 }
 0x133   : > { %305 = vst.msk [vmem:[#allocation4] sm:$0xff] %vm304_vm6, %v303_v19  ;;  %280 = vadd.xlane.f32.xlu1 %v279_v20  ;;  %v293_v21 = vsel %vm292_vm13, 1.0, %v695_v15 }
 0x134   : > { %v294_v22 = vsel %vm271_vm2, %v293_v21, 0.0 }
 0x137   : > { %295 = vadd.xlane.f32.xlu1 %v294_v22 }
 0x1bc   : > { %v281_v23 = vpop.xlane.xlu1 %280 }
 0x1bd   : > { %v282_v24 = vmax.f32 %v281_v23, 1.0 }
 0x1bf   : > { %654 = vrcp.f32 %v282_v24 }
 0x1c0   : > { %v296_v25 = vpop.xlane.xlu1 %295 }
 0x1c1   : > { %v297_v26 = vmax.f32 %v296_v25, 1.0 }
 0x1c3   : > { %656 = vrcp.f32 %v297_v26 }
 0x1cc   : > { %v655_v27 = vpop.eup %654 }
 0x1cd   : > { %v284_v28 = vmul.f32 %v655_v27, %v278_v18 }
 0x1cf   : > { %300 = vst.msk [vmem:[#allocation2] sm:$0xff] %vm271_vm2, %v284_v28 }
 0x1d0   : > { %v657_v29 = vpop.eup %656 }
 0x1d1   : > { %v299_v30 = vmul.f32 %v657_v29, %v293_v21 }
 0x1d3   : > { %301 = vst.msk [vmem:[#allocation3] sm:$0xff] %vm271_vm2, %v299_v30 }
 0x1d4 PF: > { %v308_v31 = vld [vmem:[%s768_s9] sm:$0xff]  ;;  %vm310_vm14 = vcmask 64512   ;;  %v696_v33 = vmov 0.0   ;;  %vm697_vm15 = vmmov 0   ;;  %v462_v45 = vld [vmem:[#allocation5] sm:$0xff]  ;;  %vm467_vm0 = vcmask 7168  }
 0x1d5   : > { %618 = vmatprep.subr.mxu0 %v696_v33  ;;  %620 = vmatprep.mubr.msk.f32.mxu0 %vm697_vm15, %v696_v33  ;;  %v469_v48 = vld [vmem:[#allocation6] sm:$0xff]  ;;  %p609_p2 = scmp.ne.s32.totalorder %s740_s22, 1 }
 0x1d6   : > { %v309_v32 = vld [vmem:[#allocation2] sm:$0xff]  ;;  %619 = vmatpush3.msra.mxu0 %v308_v31  ;;  %623 = vmatprep.subr.mxu1 %v696_v33  ;;  %s814_s18 = sld [smem:[#allocation7]] (!%p609_p2) }
 0x1d7   : > { %621 = vmatmul.mubr.msk.f32.vlgmr.msra.gmra.mxu0 %vm310_vm14, %v309_v32  ;;  %624 = vmatpush3.msra.mxu1 %v308_v31  ;;  %s816_s19 = sld [smem:[#allocation7 + $0x1]] (!%p609_p2) }
 0x1d8   : > { %625 = vmatprep.mubr.msk.f32.mxu1 %vm697_vm15, %v696_v33  ;;  %s818_s20 = sld [smem:[#allocation7 + $0x2]] (!%p609_p2) }
 0x1da   : > { %v384_v34 = vld [vmem:[#allocation3] sm:$0xff] }
 0x1db   : > { %626 = vmatmul.mubr.msk.f32.vlgmr.msra.gmra.mxu1 %vm310_vm14, %v384_v34 }
 0x1dc   : > { %s520_s22 = smul.f32 (!%p609_p2), 0.5, %s814_s18 }
 0x1dd   : > { %s521_s23 = smul.f32 (!%p609_p2), 0.1, %s816_s19 }
 0x1de   : > { %s523_s25 = smul.f32 (!%p609_p2), 0.2, %s818_s20 }
 0x1df   : > { %s522_s24 = sadd.f32 (!%p609_p2), %s521_s23, %s520_s22 }
 0x1e1   : > { %s524_s26 = sadd.f32 (!%p609_p2), %s523_s25, %s522_s24 }
 0x297   : > { %v380_v35 = vpop.f32.mrf.mxu0 }
 0x298   : > { %v458_v36 = vsub.f32 %v308_v31, %v380_v35 }
 0x299   : > { %v622_v37 = vpop.f32.mrf.mxu0 }
 0x29a   : > { %v459_v40 = vadd.f32 1e-06, %v458_v36 }
 0x29b   : > { %v454_v38 = vpop.f32.mrf.mxu1 }
 0x29c   : > { %v460_v39 = vsub.f32 %v308_v31, %v454_v38  ;;  %v463_v43 = vmul.f32 %v459_v40, %v459_v40 }
 0x29d   : > { %v627_v41 = vpop.f32.mrf.mxu1 }
 0x29e   : > { %v461_v42 = vadd.f32 1e-06, %v460_v39  ;;  %464 = vadd.xlane.f32.xlu0 %v463_v43 }
 0x2a0   : > { %v470_v44 = vmul.f32 %v461_v42, %v461_v42 }
 0x2a2   : > { %471 = vadd.xlane.f32.xlu0 %v470_v44 }
 0x327   : > { %v465_v46 = vpop.xlane.xlu0 %464 }
 0x328   : > { %v466_v47 = vadd.f32 %v465_v46, %v462_v45 }
 0x32a   : > { %468 = vst.msk [vmem:[#allocation5] sm:$0xff] %vm467_vm0, %v466_v47  ;;  %478 = sbr.rel (%p609_p2) target bundleno = 1001 (0x3e9), region = 56 }
 0x32b   : > { %v472_v49 = vpop.xlane.xlu0 %471 }
 0x32c   : > { %v473_v50 = vadd.f32 %v472_v49, %v469_v48 }
 0x32e   : > { %474 = vst.msk [vmem:[#allocation6] sm:$0xff] %vm467_vm0, %v473_v50 }
 0x32f   : > { %v498_v53 = vld [vmem:[#allocation4] sm:$0xff]  ;;  %v698_v54 = vmov 0   ;;  %v526_v22 = vstv %s524_s26  ;;  %v528_v25 = vlaneseq  ;;  %v538_v27 = vstv %s814_s18 }
 0x330   : > { %658 = vset.pattern.permute.xlu0 %v698_v54  ;;  %v499_v55 = vsel %vm467_vm0, %v498_v53, 0.0  ;;  %v542_v28 = vstv %s816_s19  ;;  %v546_v31 = vstv %s818_s20 }
 0x331   : > { %v479_v51 = vld [vmem:[#allocation5] sm:$0xff]  ;;  %v500_v56 = vrot.slane %v499_v55, 4  ;;  %v529_v26 = vand.u32 127, %v528_v25 }
 0x332   : > { %659 = vrsqrt.f32 %v479_v51  ;;  %vm482_vm1 = vcmp.eq.f32.partialorder %v479_v51, inf  ;;  %v485_v62 = vand.u32 2147483648, %v479_v51  ;;  %vm484_vm2 = vcmp.eq.f32.partialorder %v479_v51, 0.0 }
 0x333   : > { %v501_v57 = vadd.f32 %v500_v56, %v499_v55  ;;  %vm537_vm5 = vcmp.eq.s32.totalorder %v529_v26, 1  ;;  %vm530_vm6 = vcmp.eq.s32.totalorder %v529_v26, 0  ;;  %vm541_vm7 = vcmp.eq.s32.totalorder %v529_v26, 2 }
 0x334   : > { %v539_v29 = vsel %vm537_vm5, %v538_v27, 0.0  ;;  %vm545_vm8 = vcmp.eq.s32.totalorder %v529_v26, 3  ;;  %v543_v32 = vsel %vm541_vm7, %v542_v28, 0.0  ;;  %vm549_vm9 = vcmp.eq.s32.totalorder %v529_v26, 4 }
 0x335   : > { %v487_v52 = vld [vmem:[#allocation6] sm:$0xff]  ;;  %v502_v58 = vrot.slane %v501_v57, 2  ;;  %v547_v35 = vsel %vm545_vm8, %v546_v31, 0.0 }
 0x336   : > { %661 = vrsqrt.f32 %v487_v52  ;;  %vm490_vm3 = vcmp.eq.f32.partialorder %v487_v52, inf  ;;  %v493_v1 = vand.u32 2147483648, %v487_v52  ;;  %vm492_vm4 = vcmp.eq.f32.partialorder %v487_v52, 0.0 }
 0x337   : > { %v503_v59 = vadd.f32 %v502_v58, %v501_v57 }
 0x339   : > { %v504_v60 = vrot.slane %v503_v59, 1 }
 0x33b   : > { %v505_v4 = vadd.f32 %v504_v60, %v503_v59 }
 0x33d   : > { %v514_v9 = vmax.f32 %v505_v4, 1.0 }
 0x33f   : > { %v660_v61 = vpop.eup %659  ;;  %663 = vrcp.f32 %v514_v9 }
 0x340   : > { %v481_v0 = vmul.f32 %v660_v61, %v479_v51 }
 0x342   : > { %v483_v3 = vsel %vm482_vm1, %v479_v51, %v481_v0 }
 0x343   : > { %v662_v63 = vpop.eup %661  ;;  %v486_v5 = vsel %vm484_vm2, %v485_v62, %v483_v3 }
 0x344   : > { %v489_v2 = vmul.f32 %v662_v63, %v487_v52 }
 0x346   : > { %v491_v6 = vsel %vm490_vm3, %v487_v52, %v489_v2 }
 0x347   : > { %v494_v7 = vsel %vm492_vm4, %v493_v1, %v491_v6 }
 0x348   : > { %v495_v8 = vsub.f32 %v486_v5, %v494_v7 }
 0x34a   : > { %v496_v10 = vadd.f32 0.3, %v495_v8 }
 0x34c   : > { %v497_v11 = vmax.f32 %v496_v10, 0.0  ;;  %v664_v19 = vpop.eup %663 }
 0x34e   : > { %v506_v12 = vmul.f32 %v498_v53, %v497_v11 }
 0x350   : > { %v507_v13 = vsel %vm467_vm0, %v506_v12, 0.0 }
 0x351   : > { %v508_v14 = vrot.slane %v507_v13, 4 }
 0x353   : > { %v509_v15 = vadd.f32 %v508_v14, %v507_v13 }
 0x355   : > { %v510_v16 = vrot.slane %v509_v15, 2 }
 0x357   : > { %v511_v17 = vadd.f32 %v510_v16, %v509_v15 }
 0x359   : > { %v512_v18 = vrot.slane %v511_v17, 1 }
 0x35b   : > { %v513_v20 = vadd.f32 %v512_v18, %v511_v17 }
 0x35d   : > { %v516_v21 = vmul.f32 %v664_v19, %v513_v20 }
 0x35f   : > { %v525_v23 = vmul.f32 0.2, %v516_v21 }
 0x361   : > { %v527_v24 = vadd.f32 %v526_v22, %v525_v23 }
 0x363   : > { %533 = vperm.xlu0 %658, %v527_v24  }
 0x367   : > { %552 = vperm.xlu0 %658, %v516_v21  }
 0x3de   : > { %v534_v30 = vpop.permute.xlu0 %533 }
 0x3df   : > { %v536_v33 = vsel %vm530_vm6, %v534_v30, 0.0 }
 0x3e0   : > { %v540_v34 = vadd.f32 %v539_v29, %v536_v33 }
 0x3e2   : > { %v544_v36 = vadd.f32 %v543_v32, %v540_v34  ;;  %v553_v37 = vpop.permute.xlu0 %552 }
 0x3e3   : > { %v555_v39 = vsel %vm549_vm9, %v553_v37, 0.0 }
 0x3e4   : > { %v548_v38 = vadd.f32 %v547_v35, %v544_v36 }
 0x3e6   : > { %v556_v40 = vadd.f32 %v555_v39, %v548_v38 }
 0x3e8   : > { %557 = vst [vmem:[%s839_s6] sm:$0x1] %v556_v40 }
 0x3e9 PF: > { %s17_s21 = sadd.s32 1, %s690_s21  }
 0x3ea   : > { %p14_p3 = scmp.ge.s32.totalorder %s17_s21, 4  }
 0x3ec   :  { %16 = sbr.rel (!%p14_p3) target bundleno = 1 (0x1), region = 83 }
 0x3f1   :  { %569 = vsyncpa [#allocation8], 1 }
 0x3f2   :  { %571 = vsyncpa [#allocation8 + $0x1], 1 }

</bundles_post_ra>
